<compile_context>
chip_gen: v6e
topology: v6e:2x2x1
jax: 0.10.0
libtpu: 0.0.40
codegen_flags: <defaults>
</compile_context>

<pallas_src>
import numpy as np
import jax
import jax.numpy as jnp
from jax.experimental import pallas as pl
from jax.experimental.pallas import tpu as pltpu


def _down_fused_kernel(x_ref, sc_ref, a1_ref, sh1_ref, a2_ref, sh2_ref, o_ref):
    # x_ref  : (C_in*H, W)               image plane, channel-major rows
    # sc_ref : (W-1, Wp)                 0/1 even-column selector (pool compaction)
    # a1_ref : (3, C_mid*H1, C_in*H-1)   banded conv1 weights (BN1 scale folded), per kx
    # sh1_ref: (C_mid*H1, 1)             BN1 shift per output row
    # a2_ref : (3, C_out*H2, C_mid*H1)   banded conv2 weights (BN2 scale folded), per kx
    # sh2_ref: (C_out*H2, 1)             BN2 shift per output row
    # o_ref  : (C_out*H2, W2)
    CH, W = x_ref.shape
    W2 = o_ref.shape[1]
    W1 = W2 + 2

    # ---- MaxPool2d(2,2): 2x2 neighbourhood maxes + even-column selection matmul ----
    x = x_ref[...]
    hmax = jnp.maximum(x[0:CH - 1, :], x[1:CH, :])           # (CH-1, W)
    hv = jnp.maximum(hmax[:, 0:W - 1], hmax[:, 1:W])         # (CH-1, W-1)
    # p[c*H + 2y, j] == pooled[c, y, j]; odd / cross-channel rows are never referenced
    # because the banded A1 matrices only index even in-channel rows.
    p = jnp.dot(hv, sc_ref[...], preferred_element_type=jnp.float32)   # (CH-1, Wp)

    # ---- Conv1 (3x3 valid, BN1 scale folded): 3 banded MXU matmuls + shift + ReLU ----
    acc1 = None
    for kx in range(3):
        t = jnp.dot(a1_ref[kx], p[:, kx:kx + W1],
                    preferred_element_type=jnp.float32)      # (C_mid*H1, W1)
        acc1 = t if acc1 is None else acc1 + t
    y1 = jnp.maximum(acc1 + sh1_ref[...], 0.0)               # (C_mid*H1, W1)

    # ---- Conv2 (3x3 valid, BN2 scale folded): 3 banded MXU matmuls + shift + ReLU ----
    acc2 = None
    for kx in range(3):
        t = jnp.dot(a2_ref[kx], y1[:, kx:kx + W2],
                    preferred_element_type=jnp.float32)      # (C_out*H2, W2)
        acc2 = t if acc2 is None else acc2 + t
    o_ref[...] = jnp.maximum(acc2 + sh2_ref[...], 0.0).astype(o_ref.dtype)


def down_pallas(x, w1, b1, g1, beta1, m1, v1, w2, b2, g2, beta2, m2, v2, *, eps=1e-5):
    """Forward pass of Down: MaxPool2d(2,2) -> (Conv3x3 valid + BN(eval) + ReLU) x 2.

    x  : (N, C_in, H, W) float32, H and W even, H >= 10 and W >= 10
    w1 : (C_mid, C_in, 3, 3), b1: (C_mid,), BN1 params g1/beta1/m1/v1: (C_mid,)
    w2 : (C_out, C_mid, 3, 3), b2: (C_out,), BN2 params g2/beta2/m2/v2: (C_out,)
    returns (N, C_out, H//2 - 4, W//2 - 4)
    """
    N, C_in, H, W = x.shape
    C_mid = w1.shape[0]
    C_out = w2.shape[0]
    assert H % 2 == 0 and W % 2 == 0, "H and W must be even for MaxPool2d(2,2)"
    Hp, Wp = H // 2, W // 2
    H1, W1 = Hp - 2, Wp - 2
    H2, W2 = Hp - 4, Wp - 4
    assert H2 >= 1 and W2 >= 1, "input too small for MaxPool(2) + two valid 3x3 convs"

    f32 = jnp.float32
    x = x.astype(f32)

    # Fold eval-mode BatchNorm: scale goes into the conv weights, shift stays separate.
    s1 = g1 / jnp.sqrt(v1 + eps)
    t1 = beta1 + (b1 - m1) * s1
    s2 = g2 / jnp.sqrt(v2 + eps)
    t2 = beta2 + (b2 - m2) * s2
    w1f = (w1 * s1[:, None, None, None]).astype(f32)
    w2f = (w2 * s2[:, None, None, None]).astype(f32)

    # Even-column selection matrix for the pool compaction: sc[2j, j] = 1.
    sc_np = np.zeros((W - 1, Wp), np.float32)
    sc_np[2 * np.arange(Wp), np.arange(Wp)] = 1.0
    sc = jnp.asarray(sc_np)

    # Block-banded conv matrices.  Sparsity patterns are static (numpy); the (traced)
    # folded weights are placed with an exact-precision einsum.
    hi = jax.lax.Precision.HIGHEST

    s1dim = C_in * H - 1                       # rows of the 2x2-max tensor
    t1_np = np.zeros((3, C_in, H1, s1dim), np.float32)
    for ky in range(3):
        for c in range(C_in):
            for y in range(H1):
                t1_np[ky, c, y, c * H + 2 * (y + ky)] = 1.0
    a1 = jnp.einsum('ocKk,Kcys->koys', w1f, jnp.asarray(t1_np),
                    precision=hi).reshape(3, C_mid * H1, s1dim)

    s2dim = C_mid * H1
    t2_np = np.zeros((3, C_mid, H2, s2dim), np.float32)
    for ky in range(3):
        for c in range(C_mid):
            for y in range(H2):
                t2_np[ky, c, y, c * H1 + (y + ky)] = 1.0
    a2 = jnp.einsum('ocKk,Kcys->koys', w2f, jnp.asarray(t2_np),
                    precision=hi).reshape(3, C_out * H2, s2dim)

    sh1 = jnp.repeat(t1.astype(f32), H1)[:, None]          # (C_mid*H1, 1)
    sh2 = jnp.repeat(t2.astype(f32), H2)[:, None]          # (C_out*H2, 1)

    x2d = x.reshape(N, C_in * H, W)                        # free reshape (contiguous NCHW)

    R1 = C_mid * H1
    R2 = C_out * H2

    flops = 2 * N * ((C_in * H - 1) * (W - 1) * Wp
                     + 3 * R1 * s1dim * W1
                     + 3 * R2 * s2dim * W2)
    bytes_accessed = 4 * (N * C_in * H * W + N * R2 * W2
                          + int(a1.size) + int(a2.size) + int(sc.size)
                          + int(sh1.size) + int(sh2.size))
    cost = pl.CostEstimate(flops=int(flops), transcendentals=0,
                           bytes_accessed=int(bytes_accessed))

    const3 = lambda n: (0, 0, 0)
    const2 = lambda n: (0, 0)

    out2d = pl.pallas_call(
        _down_fused_kernel,
        out_shape=jax.ShapeDtypeStruct((N, R2, W2), f32),
        grid_spec=pltpu.PrefetchScalarGridSpec(
            num_scalar_prefetch=0,
            grid=(N,),
            in_specs=[
                pl.BlockSpec((pl.Squeezed(), C_in * H, W), lambda n: (n, 0, 0)),
                pl.BlockSpec((W - 1, Wp), const2),
                pl.BlockSpec((3, R1, s1dim), const3),
                pl.BlockSpec((R1, 1), const2),
                pl.BlockSpec((3, R2, s2dim), const3),
                pl.BlockSpec((R2, 1), const2),
            ],
            out_specs=pl.BlockSpec((pl.Squeezed(), R2, W2), lambda n: (n, 0, 0)),
        ),
        compiler_params=pltpu.CompilerParams(
            dimension_semantics=("parallel",)),
        cost_estimate=cost,
    )(x2d, sc, a1, sh1, a2, sh2)

    # Rows are (out_channel, out_row) channel-major -> free reshape back to NCHW.
    return out2d.reshape(N, C_out, H2, W2)


if __name__ == "__main__":
    key = jax.random.PRNGKey(0)
    keys = jax.random.split(key, 12)

    N, C_in, C_out, H, W = 2, 4, 8, 16, 16
    C_mid = C_out
    eps = 1e-5

    x = jax.random.normal(keys[0], (N, C_in, H, W), dtype=jnp.float32)

    def conv_init(k, co, ci):
        kw, kb = jax.random.split(k)
        bound = 1.0 / (ci * 9) ** 0.5
        w = jax.random.uniform(kw, (co, ci, 3, 3), minval=-bound, maxval=bound,
                               dtype=jnp.float32)
        b = jax.random.uniform(kb, (co,), minval=-bound, maxval=bound,
                               dtype=jnp.float32)
        return w, b

    w1, b1 = conv_init(keys[1], C_mid, C_in)
    w2, b2 = conv_init(keys[2], C_out, C_mid)

    g1 = jax.random.uniform(keys[3], (C_mid,), minval=0.5, maxval=1.5, dtype=jnp.float32)
    beta1 = 0.1 * jax.random.normal(keys[4], (C_mid,), dtype=jnp.float32)
    m1 = 0.1 * jax.random.normal(keys[5], (C_mid,), dtype=jnp.float32)
    v1 = jax.random.uniform(keys[6], (C_mid,), minval=0.5, maxval=1.5, dtype=jnp.float32)

    g2 = jax.random.uniform(keys[7], (C_out,), minval=0.5, maxval=1.5, dtype=jnp.float32)
    beta2 = 0.1 * jax.random.normal(keys[8], (C_out,), dtype=jnp.float32)
    m2 = 0.1 * jax.random.normal(keys[9], (C_out,), dtype=jnp.float32)
    v2 = jax.random.uniform(keys[10], (C_out,), minval=0.5, maxval=1.5, dtype=jnp.float32)

    out = down_pallas(x, w1, b1, g1, beta1, m1, v1,
                      w2, b2, g2, beta2, m2, v2, eps=eps)
    out = jax.block_until_ready(out)

    # Pure-JAX reference (MaxPool2d(2,2) -> conv3x3 valid -> eval-mode BN -> ReLU, twice).
    def ref_down(x):
        p = jnp.max(x.reshape(N, C_in, H // 2, 2, W // 2, 2), axis=(3, 5))

        def block(z, w, b, g, beta, m, v):
            y = jax.lax.conv_general_dilated(
                z, w, window_strides=(1, 1), padding="VALID",
                dimension_numbers=("NCHW", "OIHW", "NCHW"))
            y = y + b[None, :, None, None]
            y = (y - m[None, :, None, None]) / jnp.sqrt(v[None, :, None, None] + eps)
            y = y * g[None, :, None, None] + beta[None, :, None, None]
            return jnp.maximum(y, 0.0)

        y = block(p, w1, b1, g1, beta1, m1, v1)
        return block(y, w2, b2, g2, beta2, m2, v2)

    ref = ref_down(x)
    assert out.shape == (N, C_out, H // 2 - 4, W // 2 - 4)
    max_err = float(jnp.max(jnp.abs(out - ref)))
    assert jnp.allclose(out, ref, atol=1e-4, rtol=1e-4), max_err

    print("KERNEL_OK")
</pallas_src>

<mosaic_0001>
module attributes {stable_mosaic.version = 11 : i64} {
  func.func @_down_fused_kernel(%arg0: i32, %arg1: memref<1x64x16xf32, #tpu.memory_space<vmem>>, %arg2: memref<15x8xf32, #tpu.memory_space<vmem>>, %arg3: memref<3x48x63xf32, #tpu.memory_space<vmem>>, %arg4: memref<48x1xf32, #tpu.memory_space<vmem>>, %arg5: memref<3x32x48xf32, #tpu.memory_space<vmem>>, %arg6: memref<32x1xf32, #tpu.memory_space<vmem>>, %arg7: memref<1x32x4xf32, #tpu.memory_space<vmem>>) attributes {dimension_semantics = [#tpu.dimension_semantics<parallel>], iteration_bounds = array<i64: 2>, scalar_prefetch = 0 : i64, scratch_operands = 0 : i64, tpu.core_type = #tpu.core_type<tc>, window_params = [{transform_indices = @transform_0, window_bounds = array<i64: 1, 64, 16>}, {pipeline_mode = #tpu.pipeline_mode<synchronous>, transform_indices = @transform_1, window_bounds = array<i64: 15, 8>}, {pipeline_mode = #tpu.pipeline_mode<synchronous>, transform_indices = @transform_2, window_bounds = array<i64: 3, 48, 63>}, {pipeline_mode = #tpu.pipeline_mode<synchronous>, transform_indices = @transform_3, window_bounds = array<i64: 48, 1>}, {pipeline_mode = #tpu.pipeline_mode<synchronous>, transform_indices = @transform_4, window_bounds = array<i64: 3, 32, 48>}, {pipeline_mode = #tpu.pipeline_mode<synchronous>, transform_indices = @transform_5, window_bounds = array<i64: 32, 1>}, {transform_indices = @transform_6, window_bounds = array<i64: 1, 32, 4>}]} {
    %c0 = arith.constant 0 : index
    %c0_0 = arith.constant 0 : index
    %c0_1 = arith.constant 0 : index
    %0 = vector.load %arg1[%c0, %c0_0, %c0_1] : memref<1x64x16xf32, #tpu.memory_space<vmem>>, vector<1x64x16xf32>
    %1 = vector.shape_cast %0 : vector<1x64x16xf32> to vector<64x16xf32>
    %2 = vector.extract_strided_slice %1 {offsets = [0, 0], sizes = [63, 16], strides = [1, 1]} : vector<64x16xf32> to vector<63x16xf32>
    %3 = vector.extract_strided_slice %1 {offsets = [1, 0], sizes = [63, 16], strides = [1, 1]} : vector<64x16xf32> to vector<63x16xf32>
    %4 = arith.maximumf %2, %3 : vector<63x16xf32>
    %5 = vector.extract_strided_slice %4 {offsets = [0, 0], sizes = [63, 15], strides = [1, 1]} : vector<63x16xf32> to vector<63x15xf32>
    %6 = vector.extract_strided_slice %4 {offsets = [0, 1], sizes = [63, 15], strides = [1, 1]} : vector<63x16xf32> to vector<63x15xf32>
    %7 = arith.maximumf %5, %6 : vector<63x15xf32>
    %c0_2 = arith.constant 0 : index
    %c0_3 = arith.constant 0 : index
    %8 = vector.load %arg2[%c0_2, %c0_3] : memref<15x8xf32, #tpu.memory_space<vmem>>, vector<15x8xf32>
    %cst = arith.constant dense<0.000000e+00> : vector<63x8xf32>
    %9 = tpu.matmul %7, %8, %cst {dimension_numbers = #tpu.dot_dimension_numbers<[1], [0], [0], [1], [0, 0, 1, 1], [], []>} : vector<63x15xf32>, vector<15x8xf32>, vector<63x8xf32> -> vector<63x8xf32>
    %c0_4 = arith.constant 0 : index
    %c0_5 = arith.constant 0 : index
    %c0_6 = arith.constant 0 : index
    %10 = vector.load %arg3[%c0_4, %c0_5, %c0_6] : memref<3x48x63xf32, #tpu.memory_space<vmem>>, vector<1x48x63xf32>
    %11 = vector.shape_cast %10 : vector<1x48x63xf32> to vector<48x63xf32>
    %12 = vector.extract_strided_slice %9 {offsets = [0, 0], sizes = [63, 6], strides = [1, 1]} : vector<63x8xf32> to vector<63x6xf32>
    %cst_7 = arith.constant dense<0.000000e+00> : vector<48x6xf32>
    %13 = tpu.matmul %11, %12, %cst_7 {dimension_numbers = #tpu.dot_dimension_numbers<[1], [0], [0], [1], [0, 0, 1, 1], [], []>} : vector<48x63xf32>, vector<63x6xf32>, vector<48x6xf32> -> vector<48x6xf32>
    %c1 = arith.constant 1 : index
    %c0_8 = arith.constant 0 : index
    %c0_9 = arith.constant 0 : index
    %14 = vector.load %arg3[%c1, %c0_8, %c0_9] : memref<3x48x63xf32, #tpu.memory_space<vmem>>, vector<1x48x63xf32>
    %15 = vector.shape_cast %14 : vector<1x48x63xf32> to vector<48x63xf32>
    %16 = vector.extract_strided_slice %9 {offsets = [0, 1], sizes = [63, 6], strides = [1, 1]} : vector<63x8xf32> to vector<63x6xf32>
    %cst_10 = arith.constant dense<0.000000e+00> : vector<48x6xf32>
    %17 = tpu.matmul %15, %16, %cst_10 {dimension_numbers = #tpu.dot_dimension_numbers<[1], [0], [0], [1], [0, 0, 1, 1], [], []>} : vector<48x63xf32>, vector<63x6xf32>, vector<48x6xf32> -> vector<48x6xf32>
    %18 = arith.addf %13, %17 : vector<48x6xf32>
    %c2 = arith.constant 2 : index
    %c0_11 = arith.constant 0 : index
    %c0_12 = arith.constant 0 : index
    %19 = vector.load %arg3[%c2, %c0_11, %c0_12] : memref<3x48x63xf32, #tpu.memory_space<vmem>>, vector<1x48x63xf32>
    %20 = vector.shape_cast %19 : vector<1x48x63xf32> to vector<48x63xf32>
    %21 = vector.extract_strided_slice %9 {offsets = [0, 2], sizes = [63, 6], strides = [1, 1]} : vector<63x8xf32> to vector<63x6xf32>
    %cst_13 = arith.constant dense<0.000000e+00> : vector<48x6xf32>
    %22 = tpu.matmul %20, %21, %cst_13 {dimension_numbers = #tpu.dot_dimension_numbers<[1], [0], [0], [1], [0, 0, 1, 1], [], []>} : vector<48x63xf32>, vector<63x6xf32>, vector<48x6xf32> -> vector<48x6xf32>
    %23 = arith.addf %18, %22 : vector<48x6xf32>
    %c0_14 = arith.constant 0 : index
    %c0_15 = arith.constant 0 : index
    %24 = vector.load %arg4[%c0_14, %c0_15] : memref<48x1xf32, #tpu.memory_space<vmem>>, vector<48x1xf32>
    %25 = vector.broadcast %24 : vector<48x1xf32> to vector<48x6xf32>
    %26 = arith.addf %23, %25 : vector<48x6xf32>
    %cst_16 = arith.constant 0.000000e+00 : f32
    %27 = vector.broadcast %cst_16 : f32 to vector<48x6xf32>
    %28 = arith.maximumf %26, %27 : vector<48x6xf32>
    %c0_17 = arith.constant 0 : index
    %c0_18 = arith.constant 0 : index
    %c0_19 = arith.constant 0 : index
    %29 = vector.load %arg5[%c0_17, %c0_18, %c0_19] : memref<3x32x48xf32, #tpu.memory_space<vmem>>, vector<1x32x48xf32>
    %30 = vector.shape_cast %29 : vector<1x32x48xf32> to vector<32x48xf32>
    %31 = vector.extract_strided_slice %28 {offsets = [0, 0], sizes = [48, 4], strides = [1, 1]} : vector<48x6xf32> to vector<48x4xf32>
    %cst_20 = arith.constant dense<0.000000e+00> : vector<32x4xf32>
    %32 = tpu.matmul %30, %31, %cst_20 {dimension_numbers = #tpu.dot_dimension_numbers<[1], [0], [0], [1], [0, 0, 1, 1], [], []>} : vector<32x48xf32>, vector<48x4xf32>, vector<32x4xf32> -> vector<32x4xf32>
    %c1_21 = arith.constant 1 : index
    %c0_22 = arith.constant 0 : index
    %c0_23 = arith.constant 0 : index
    %33 = vector.load %arg5[%c1_21, %c0_22, %c0_23] : memref<3x32x48xf32, #tpu.memory_space<vmem>>, vector<1x32x48xf32>
    %34 = vector.shape_cast %33 : vector<1x32x48xf32> to vector<32x48xf32>
    %35 = vector.extract_strided_slice %28 {offsets = [0, 1], sizes = [48, 4], strides = [1, 1]} : vector<48x6xf32> to vector<48x4xf32>
    %cst_24 = arith.constant dense<0.000000e+00> : vector<32x4xf32>
    %36 = tpu.matmul %34, %35, %cst_24 {dimension_numbers = #tpu.dot_dimension_numbers<[1], [0], [0], [1], [0, 0, 1, 1], [], []>} : vector<32x48xf32>, vector<48x4xf32>, vector<32x4xf32> -> vector<32x4xf32>
    %37 = arith.addf %32, %36 : vector<32x4xf32>
    %c2_25 = arith.constant 2 : index
    %c0_26 = arith.constant 0 : index
    %c0_27 = arith.constant 0 : index
    %38 = vector.load %arg5[%c2_25, %c0_26, %c0_27] : memref<3x32x48xf32, #tpu.memory_space<vmem>>, vector<1x32x48xf32>
    %39 = vector.shape_cast %38 : vector<1x32x48xf32> to vector<32x48xf32>
    %40 = vector.extract_strided_slice %28 {offsets = [0, 2], sizes = [48, 4], strides = [1, 1]} : vector<48x6xf32> to vector<48x4xf32>
    %cst_28 = arith.constant dense<0.000000e+00> : vector<32x4xf32>
    %41 = tpu.matmul %39, %40, %cst_28 {dimension_numbers = #tpu.dot_dimension_numbers<[1], [0], [0], [1], [0, 0, 1, 1], [], []>} : vector<32x48xf32>, vector<48x4xf32>, vector<32x4xf32> -> vector<32x4xf32>
    %42 = arith.addf %37, %41 : vector<32x4xf32>
    %c0_29 = arith.constant 0 : index
    %c0_30 = arith.constant 0 : index
    %43 = vector.load %arg6[%c0_29, %c0_30] : memref<32x1xf32, #tpu.memory_space<vmem>>, vector<32x1xf32>
    %44 = vector.broadcast %43 : vector<32x1xf32> to vector<32x4xf32>
    %45 = arith.addf %42, %44 : vector<32x4xf32>
    %cst_31 = arith.constant 0.000000e+00 : f32
    %46 = vector.broadcast %cst_31 : f32 to vector<32x4xf32>
    %47 = arith.maximumf %45, %46 : vector<32x4xf32>
    %c0_32 = arith.constant 0 : index
    %c0_33 = arith.constant 0 : index
    %c0_34 = arith.constant 0 : index
    %48 = vector.load %arg7[%c0_32, %c0_33, %c0_34] : memref<1x32x4xf32, #tpu.memory_space<vmem>>, vector<1x32x4xf32>
    %49 = vector.shape_cast %48 : vector<1x32x4xf32> to vector<32x4xf32>
    %50 = vector.shape_cast %47 : vector<32x4xf32> to vector<1x32x4xf32>
    tpu.vector_store %arg7[%c0_32, %c0_33, %c0_34], %50 {strides = array<i32>} : memref<1x32x4xf32, #tpu.memory_space<vmem>>, vector<1x32x4xf32>,
    return
  }
  func.func @transform_0(%arg0: i32) -> (i32, i32, i32) {
    %c0_i32 = arith.constant 0 : i32
    %c0_i32_0 = arith.constant 0 : i32
    %c0_i32_1 = arith.constant 0 : i32
    return %arg0, %c0_i32, %c0_i32_0 : i32, i32, i32
  }
  func.func @transform_1(%arg0: i32) -> (i32, i32) {
    %c0_i32 = arith.constant 0 : i32
    %c0_i32_0 = arith.constant 0 : i32
    %c0_i32_1 = arith.constant 0 : i32
    return %c0_i32, %c0_i32_0 : i32, i32
  }
  func.func @transform_2(%arg0: i32) -> (i32, i32, i32) {
    %c0_i32 = arith.constant 0 : i32
    %c0_i32_0 = arith.constant 0 : i32
    %c0_i32_1 = arith.constant 0 : i32
    %c0_i32_2 = arith.constant 0 : i32
    return %c0_i32, %c0_i32_0, %c0_i32_1 : i32, i32, i32
  }
  func.func @transform_3(%arg0: i32) -> (i32, i32) {
    %c0_i32 = arith.constant 0 : i32
    %c0_i32_0 = arith.constant 0 : i32
    %c0_i32_1 = arith.constant 0 : i32
    return %c0_i32, %c0_i32_0 : i32, i32
  }
  func.func @transform_4(%arg0: i32) -> (i32, i32, i32) {
    %c0_i32 = arith.constant 0 : i32
    %c0_i32_0 = arith.constant 0 : i32
    %c0_i32_1 = arith.constant 0 : i32
    %c0_i32_2 = arith.constant 0 : i32
    return %c0_i32, %c0_i32_0, %c0_i32_1 : i32, i32, i32
  }
  func.func @transform_5(%arg0: i32) -> (i32, i32) {
    %c0_i32 = arith.constant 0 : i32
    %c0_i32_0 = arith.constant 0 : i32
    %c0_i32_1 = arith.constant 0 : i32
    return %c0_i32, %c0_i32_0 : i32, i32
  }
  func.func @transform_6(%arg0: i32) -> (i32, i32, i32) {
    %c0_i32 = arith.constant 0 : i32
    %c0_i32_0 = arith.constant 0 : i32
    %c0_i32_1 = arith.constant 0 : i32
    return %arg0, %c0_i32, %c0_i32_0 : i32, i32, i32
  }
}

</mosaic_0001>

<bundles_post_ra>
// kernel: tpu_custom_call.1
= control target key start
LH: loop header
LB: loop body
LE: loop exit
PB: predicated region body
PF: predicated region fallthrough
CT: control target
= control target key end

     0   :  { %s1754_s21 = smov 0   ;;  %s2012_s0 = inlined_call_operand.vmem [shape: f32[2,64,16], index: 0, kind: input, shape index: {}]   ;;  %s2013_s1 = inlined_call_operand.vmem [shape: f32[15,8], index: 1, kind: input, shape index: {}]   ;;  %s2014_s2 = inlined_call_operand.vmem [shape: f32[3,48,63], index: 2, kind: input, shape index: {}]   ;;  %s2015_s3 = inlined_call_operand.vmem [shape: f32[48,1], index: 3, kind: input, shape index: {}]   ;;  %s2016_s4 = inlined_call_operand.vmem [shape: f32[3,32,48], index: 4, kind: input, shape index: {}]   ;;  %s2017_s5 = inlined_call_operand.vmem [shape: f32[32,1], index: 5, kind: input, shape index: {}]   ;;  %s2018_s6 = inlined_call_operand.vmem [shape: f32[2,32,4], index: 6, kind: output, shape index: {}]  }
   0x1 LB: > { %s1393_s22 = sadd.s32 4294967295, %s1714_s21   ;;  %p1397_p0 = scmp.ge.s32.totalorder %s1714_s21, 1  ;;  %s1714_s21 = sphi %s1754_s21, %s16_s21  }
   0x2   : > { %p212_p1 = scmp.lt.s32.totalorder %s1714_s21, 3 }
   0x4   : > { %p213_p2 = pnand %p1397_p0, %p212_p1 }
   0x5   : > { %p242_p3 = scmp.lt.s32.totalorder (!%p213_p2), %s1393_s22, 1  ;;  %s1716_s7 = smov (!%p213_p2), 127  }
   0x6   : > { %216 = sbr.rel (%p213_p2) target bundleno = 1049 (0x419), region = 44  ;;  %s1717_s16 = smov (!%p213_p2), 126  }
   0xb   : > { %vm268_vm0 = vcmask 1046528   ;;  %v341_v0 = vld [vmem:[%s2013_s1 + $0x8] sm:$0x7f]  ;;  %s2020_s22 = smov (!%p242_p3, %s1393_s22), 1  ;;  %v340_v1 = vld [vmem:[%s2013_s1] sm:$0xff]  ;;  %vm342_vm1 = vcmask 121856  }
   0xc   : > { %1550 = vmatprep.subr.msk.mxu0 %vm268_vm0, %v341_v0  ;;  %s1466_s27 = sshll.u32 %s2020_s22, 6  ;;  %v1411_v57 = vld [vmem:[%s2014_s2 + $0x30] sm:$0xff]  ;;  %vm519_vm2 = vcmask 515072   ;;  %v475_v58 = vld [vmem:[%s2014_s2] sm:$0xff]  ;;  %v476_v59 = vld [vmem:[%s2014_s2 + $0x8] sm:$0xff]  ;;  %vm982_vm3 = vcmask 392192  }
   0xd   : > { %1551 = vmatpush3.msk.msra.mxu0 %vm268_vm0, %v341_v0  ;;  %s246_s30 = scalar_lea.vmem %s2012_s0, %s1466_s27  ;;  %1582 = vmatprep.mubr.msk.f32.mxu1 %vm519_vm2, %v1411_v57  ;;  %v477_v60 = vld [vmem:[%s2014_s2 + $0x10] sm:$0xff]  ;;  %v478_v61 = vld [vmem:[%s2014_s2 + $0x18] sm:$0xff]  ;;  %v479_v62 = vld [vmem:[%s2014_s2 + $0x20] sm:$0xff]  ;;  %v1718_v0 = vmov 0   ;;  %s1467_s28 = sshll.u32 %s2020_s22, 5  ;;  %vm1333_vm4 = vcmask 31744  }
   0xe   : > { %1552 = vmatprep.subr.mxu0 %v340_v1  ;;  %v252_v2 = vld [vmem:[%s246_s30] sm:$0xff]  ;;  %v253_v3 = vld [vmem:[%s246_s30 + $0x8] sm:$0xff]  ;;  %v254_v4 = vld [vmem:[%s246_s30 + $0x10] sm:$0xff]  ;;  %1707 = vset.pattern.permute.xlu1 %v1718_v0 }
   0xf   : > { %1553 = vmatpush3.msra.mxu0 %v340_v1  ;;  %v269_v5 = vrot.slane %v252_v2, 1  ;;  %v270_v6 = vrot.slane %v253_v3, 1  ;;  %v255_v7 = vld [vmem:[%s246_s30 + $0x18] sm:$0xff]  ;;  %v272_v8 = vrot.slane %v254_v4, 1  ;;  %v256_v9 = vld [vmem:[%s246_s30 + $0x20] sm:$0xff]  ;;  %v257_v10 = vld [vmem:[%s246_s30 + $0x28] sm:$0xff]  ;;  %1706 = vset.pattern.permute.xlu0 %v1718_v0 }
  0x10   : > { %v274_v11 = vrot.slane %v255_v7, 1  ;;  %v276_v12 = vrot.slane %v256_v9, 1  ;;  %v258_v13 = vld [vmem:[%s246_s30 + $0x30] sm:$0xff]  ;;  %v278_v16 = vrot.slane %v257_v10, 1  ;;  %v259_v21 = vld [vmem:[%s246_s30 + $0x38] sm:$0xff]  ;;  %v480_v63 = vld [vmem:[%s2014_s2 + $0x28] sm:$0xff]  ;;  %s251_s30 = scalar_lea.vmem %s2018_s6, %s1467_s28 }
  0x11   : > { %v271_v14 = vsel %vm268_vm0, %v269_v5, %v270_v6  ;;  %v273_v15 = vsel %vm268_vm0, %v270_v6, %v272_v8  ;;  %v280_v20 = vrot.slane %v258_v13, 1  ;;  %v282_v26 = vrot.slane %v259_v21, 1  ;;  %v906_v1 = vld [vmem:[%s2015_s3 + $0x28] sm:$0xff]  ;;  %v901_v5 = vld [vmem:[%s2015_s3] sm:$0xff] }
  0x12   : > { %v292_v17 = vmax.f32 %v252_v2, %v271_v14  ;;  %v275_v18 = vsel %vm268_vm0, %v272_v8, %v274_v11  ;;  %v277_v19 = vsel %vm268_vm0, %v274_v11, %v276_v12  ;;  %v293_v23 = vmax.f32 %v253_v3, %v273_v15  ;;  %v905_v2 = vld [vmem:[%s2015_s3 + $0x20] sm:$0xff]  ;;  %v903_v3 = vld [vmem:[%s2015_s3 + $0x10] sm:$0xff]  ;;  %v902_v6 = vld [vmem:[%s2015_s3 + $0x8] sm:$0xff] }
  0x13   : > { %v294_v22 = vmax.f32 %v254_v4, %v275_v18  ;;  %v295_v24 = vmax.f32 %v255_v7, %v277_v19  ;;  %v279_v25 = vsel %vm268_vm0, %v276_v12, %v278_v16  ;;  %v281_v27 = vsel %vm268_vm0, %v278_v16, %v280_v20  ;;  %v904_v4 = vld [vmem:[%s2015_s3 + $0x18] sm:$0xff]  ;;  %v1413_v16 = vld [vmem:[%s2014_s2 + $0x40] sm:$0xff]  ;;  %v1414_v19 = vld [vmem:[%s2014_s2 + $0x48] sm:$0xff] }
  0x14   : > { %308 = vrot.lane.b32.xlu0 %v292_v17, %s1716_s7  ;;  %v296_v28 = vmax.f32 %v256_v9, %v279_v25  ;;  %v297_v29 = vmax.f32 %v257_v10, %v281_v27  ;;  %v283_v30 = vsel %vm268_vm0, %v280_v20, %v282_v26  ;;  %v299_v32 = vmax.f32 %v259_v21, %v282_v26  ;;  %v1412_v15 = vld [vmem:[%s2014_s2 + $0x38] sm:$0xff]  ;;  %v1415_v20 = vld [vmem:[%s2014_s2 + $0x50] sm:$0xff] }
  0x15   : > { %312 = vrot.lane.b32.xlu1 %v294_v22, %s1716_s7  ;;  %v298_v31 = vmax.f32 %v258_v13, %v283_v30  ;;  %v1433_v30 = vld [vmem:[%s2014_s2 + $0x70] sm:$0xff] }
  0x18   : > { %310 = vrot.lane.b32.xlu0 %v293_v23, %s1716_s7 }
  0x19   : > { %314 = vrot.lane.b32.xlu1 %v295_v24, %s1716_s7 }
  0x1c   : > { %316 = vrot.lane.b32.xlu0 %v296_v28, %s1716_s7 }
  0x1d   : > { %318 = vrot.lane.b32.xlu1 %v297_v29, %s1716_s7 }
  0x20   : > { %320 = vrot.lane.b32.xlu0 %v298_v31, %s1716_s7 }
  0x21   : > { %322 = vrot.lane.b32.xlu1 %v299_v32, %s1716_s7 }
  0x86   : > { %v309_v33 = vpop.permute.xlu0 %308 }
  0x87   : > { %v332_v34 = vmax.f32 %v292_v17, %v309_v33  ;;  %v313_v35 = vpop.permute.xlu1 %312  ;;  %v1436_v33 = vld [vmem:[%s2014_s2 + $0x88] sm:$0xff] }
  0x88   : > { %v334_v36 = vmax.f32 %v294_v22, %v313_v35 }
  0x89   : > { %1554 = vmatprep.mubr.msk.f32.mxu0 %vm342_vm1, %v332_v34 }
  0x8a   : > { %v311_v37 = vpop.permute.xlu0 %310 }
  0x8b   : > { %v333_v38 = vmax.f32 %v293_v23, %v311_v37  ;;  %v315_v39 = vpop.permute.xlu1 %314  ;;  %v1416_v23 = vld [vmem:[%s2014_s2 + $0x58] sm:$0xff] }
  0x8c   : > { %v335_v40 = vmax.f32 %v295_v24, %v315_v39  ;;  %v1431_v24 = vld [vmem:[%s2014_s2 + $0x60] sm:$0xff] }
  0x8d   : > { %1555 = vmatmul.mubr.msk.f32.vlgmr.msra.gmra.mxu0 %vm342_vm1, %v333_v38 }
  0x8e   : > { %1557 = vmatprep.mubr.msk.f32.mxu0 %vm342_vm1, %v334_v36  ;;  %v317_v41 = vpop.permute.xlu0 %316 }
  0x8f   : > { %v336_v42 = vmax.f32 %v296_v28, %v317_v41  ;;  %v319_v43 = vpop.permute.xlu1 %318 }
  0x90   : > { %v337_v44 = vmax.f32 %v297_v29, %v319_v43  ;;  %v1432_v29 = vld [vmem:[%s2014_s2 + $0x68] sm:$0xff] }
  0x91   : > { %1558 = vmatmul.mubr.msk.f32.gmra.mxu0 %vm342_vm1, %v335_v40 }
  0x92   : > { %1560 = vmatprep.mubr.msk.f32.mxu0 %vm342_vm1, %v336_v42  ;;  %v321_v45 = vpop.permute.xlu0 %320 }
  0x93   : > { %v338_v46 = vmax.f32 %v298_v31, %v321_v45  ;;  %v323_v47 = vpop.permute.xlu1 %322  ;;  %v1434_v31 = vld [vmem:[%s2014_s2 + $0x78] sm:$0xff] }
  0x94   : > { %v339_v48 = vmax.f32 %v299_v32, %v323_v47  ;;  %v1435_v32 = vld [vmem:[%s2014_s2 + $0x80] sm:$0xff] }
  0x95   : > { %1561 = vmatmul.mubr.msk.f32.gmra.mxu0 %vm342_vm1, %v337_v44 }
  0x96   : > { %1563 = vmatprep.mubr.msk.f32.mxu0 %vm342_vm1, %v338_v46 }
  0x99   : > { %1564 = vmatmul.mubr.msk.f32.gmra.mxu0 %vm342_vm1, %v339_v48 }
  0x9a   : > { %1607 = vmatprep.mubr.msk.f32.mxu0 %vm519_vm2, %v475_v58 }
 0x14d   : > { %v1556_v49 = vpop.f32.mrf.mxu0 }
 0x14f   : > { %v436_v50 = vpop.f32.mrf.mxu0 }
 0x151   : > { %v1559_v51 = vpop.f32.mrf.mxu0 }
 0x153   : > { %v446_v52 = vpop.f32.mrf.mxu0 }
 0x155   : > { %v1562_v53 = vpop.f32.mrf.mxu0 }
 0x157   : > { %v456_v54 = vpop.f32.mrf.mxu0 }
 0x159   : > { %v1565_v55 = vpop.f32.mrf.mxu0 }
 0x15a   : > { %510 = vrot.lane.b32.xlu0 %v1565_v55, %s1716_s7  ;;  %1591 = vmatprep.subr.msk.mxu0 %vm268_vm0, %v1565_v55 }
 0x15b   : > { %v466_v56 = vpop.f32.mrf.mxu0  ;;  %1592 = vmatpush3.msk.msra.mxu0 %vm268_vm0, %v1565_v55 }
 0x15c   : > { %508 = vrot.lane.b32.xlu1 %v466_v56, %s1716_s7  ;;  %1593 = vmatprep.subr.mxu0 %v466_v56 }
 0x15d   : > { %1594 = vmatpush3.msra.mxu0 %v466_v56 }
 0x15e   : > { %506 = vrot.lane.b32.xlu0 %v1562_v53, %s1716_s7  ;;  %1595 = vmatprep.subr.mxu0 %v1562_v53 }
 0x15f   : > { %1596 = vmatpush3.msra.mxu0 %v1562_v53 }
 0x160   : > { %504 = vrot.lane.b32.xlu1 %v456_v54, %s1716_s7  ;;  %1597 = vmatprep.subr.mxu0 %v456_v54 }
 0x161   : > { %1598 = vmatpush3.msra.mxu0 %v456_v54 }
 0x162   : > { %502 = vrot.lane.b32.xlu0 %v1559_v51, %s1716_s7  ;;  %1599 = vmatprep.subr.mxu0 %v1559_v51 }
 0x163   : > { %1600 = vmatpush3.msra.mxu0 %v1559_v51 }
 0x164   : > { %500 = vrot.lane.b32.xlu1 %v446_v52, %s1716_s7  ;;  %1601 = vmatprep.subr.mxu0 %v446_v52 }
 0x165   : > { %1602 = vmatpush3.msra.mxu0 %v446_v52 }
 0x166   : > { %498 = vrot.lane.b32.xlu0 %v1556_v49, %s1716_s7  ;;  %1603 = vmatprep.subr.mxu0 %v1556_v49 }
 0x167   : > { %1604 = vmatpush3.msra.mxu0 %v1556_v49 }
 0x168   : > { %496 = vrot.lane.b32.xlu1 %v436_v50, %s1716_s7  ;;  %1605 = vmatprep.subr.mxu0 %v436_v50 }
 0x169   : > { %1606 = vmatpush3.msra.mxu0 %v436_v50 }
 0x16a   : > { %771 = vrot.lane.b32.xlu0 %v1565_v55, %s1717_s16  ;;  %1608 = vmatmul.mubr.msk.f32.vlgmr.msra.gmra.mxu0 %vm519_vm2, %v476_v59 }
 0x16b   : > { %1610 = vmatprep.mubr.msk.f32.mxu0 %vm519_vm2, %v477_v60 }
 0x16c   : > { %769 = vrot.lane.b32.xlu1 %v466_v56, %s1717_s16 }
 0x16e   : > { %767 = vrot.lane.b32.xlu0 %v1562_v53, %s1717_s16  ;;  %1611 = vmatmul.mubr.msk.f32.gmra.mxu0 %vm519_vm2, %v478_v61 }
 0x16f   : > { %1613 = vmatprep.mubr.msk.f32.mxu0 %vm519_vm2, %v479_v62 }
 0x170   : > { %765 = vrot.lane.b32.xlu1 %v456_v54, %s1717_s16 }
 0x172   : > { %763 = vrot.lane.b32.xlu0 %v1559_v51, %s1717_s16  ;;  %1614 = vmatmul.mubr.msk.f32.gmra.mxu0 %vm519_vm2, %v480_v63 }
 0x174   : > { %761 = vrot.lane.b32.xlu1 %v446_v52, %s1717_s16 }
 0x176   : > { %759 = vrot.lane.b32.xlu0 %v1556_v49, %s1717_s16 }
 0x178   : > { %757 = vrot.lane.b32.xlu1 %v436_v50, %s1717_s16 }
 0x17a   : > { %934 = vperm.xlu0 %1706, %v906_v1  }
 0x17c   : > { %929 = vperm.xlu1 %1707, %v905_v2  }
 0x17e   : > { %919 = vperm.xlu0 %1706, %v903_v3   ;;  %v1444_v3 = vld [vmem:[%s2016_s4 + $0x20] sm:$0xff] }
 0x17f   : > { %1653 = vmatprep.mubr.msk.f32.mxu0 %vm982_vm3, %v1444_v3 }
 0x180   : > { %924 = vperm.xlu1 %1707, %v904_v4  }
 0x182   : > { %909 = vperm.xlu0 %1706, %v901_v5  }
 0x184   : > { %914 = vperm.xlu1 %1707, %v902_v6  }
 0x1cc   : > { %v511_v7 = vpop.permute.xlu0 %510 }
 0x1cd   : > { %1566 = vmatprep.subr.msk.mxu1 %vm268_vm0, %v511_v7 }
 0x1ce   : > { %1567 = vmatpush3.msk.msra.mxu1 %vm268_vm0, %v511_v7  ;;  %v509_v8 = vpop.permute.xlu1 %508 }
 0x1cf   : > { %1568 = vmatprep.subr.mxu1 %v509_v8 }
 0x1d0   : > { %v507_v9 = vpop.permute.xlu0 %506  ;;  %1569 = vmatpush3.msra.mxu1 %v509_v8 }
 0x1d1   : > { %1570 = vmatprep.subr.mxu1 %v507_v9 }
 0x1d2   : > { %1571 = vmatpush3.msra.mxu1 %v507_v9  ;;  %v505_v10 = vpop.permute.xlu1 %504 }
 0x1d3   : > { %1572 = vmatprep.subr.mxu1 %v505_v10 }
 0x1d4   : > { %v503_v11 = vpop.permute.xlu0 %502  ;;  %1573 = vmatpush3.msra.mxu1 %v505_v10 }
 0x1d5   : > { %1574 = vmatprep.subr.mxu1 %v503_v11 }
 0x1d6   : > { %1575 = vmatpush3.msra.mxu1 %v503_v11  ;;  %v501_v12 = vpop.permute.xlu1 %500 }
 0x1d7   : > { %1576 = vmatprep.subr.mxu1 %v501_v12 }
 0x1d8   : > { %v499_v13 = vpop.permute.xlu0 %498  ;;  %1577 = vmatpush3.msra.mxu1 %v501_v12 }
 0x1d9   : > { %1578 = vmatprep.subr.mxu1 %v499_v13 }
 0x1da   : > { %1579 = vmatpush3.msra.mxu1 %v499_v13  ;;  %v497_v14 = vpop.permute.xlu1 %496 }
 0x1db   : > { %1580 = vmatprep.subr.mxu1 %v497_v14 }
 0x1dc   : > { %v772_v17 = vpop.permute.xlu0 %771  ;;  %1581 = vmatpush3.msra.mxu1 %v497_v14 }
 0x1dd   : > { %1583 = vmatmul.mubr.msk.f32.vlgmr.msra.gmra.mxu1 %vm519_vm2, %v1412_v15  ;;  %1616 = vmatprep.subr.msk.mxu1 %vm268_vm0, %v772_v17 }
 0x1de   : > { %1617 = vmatpush3.msk.msra.mxu1 %vm268_vm0, %v772_v17  ;;  %v770_v18 = vpop.permute.xlu1 %769  ;;  %1585 = vmatprep.mubr.msk.f32.mxu1 %vm519_vm2, %v1413_v16 }
 0x1df   : > { %1618 = vmatprep.subr.mxu1 %v770_v18 }
 0x1e0   : > { %v768_v21 = vpop.permute.xlu0 %767  ;;  %1619 = vmatpush3.msra.mxu1 %v770_v18 }
 0x1e1   : > { %1620 = vmatprep.subr.mxu1 %v768_v21  ;;  %1586 = vmatmul.mubr.msk.f32.gmra.mxu1 %vm519_vm2, %v1414_v19  ;;  %v1456_v19 = vld [vmem:[%s2016_s4 + $0x40] sm:$0xff] }
 0x1e2   : > { %1621 = vmatpush3.msra.mxu1 %v768_v21  ;;  %v766_v22 = vpop.permute.xlu1 %765  ;;  %1588 = vmatprep.mubr.msk.f32.mxu1 %vm519_vm2, %v1415_v20  ;;  %v1301_v20 = vld [vmem:[%s2017_s5] sm:$0xff]  ;;  %v1302_v21 = vld [vmem:[%s2017_s5 + $0x8] sm:$0xff] }
 0x1e3   : > { %1622 = vmatprep.subr.mxu1 %v766_v22 }
 0x1e4   : > { %v764_v25 = vpop.permute.xlu0 %763  ;;  %1623 = vmatpush3.msra.mxu1 %v766_v22  ;;  %v1303_v22 = vld [vmem:[%s2017_s5 + $0x10] sm:$0xff] }
 0x1e5   : > { %1624 = vmatprep.subr.mxu1 %v764_v25  ;;  %1589 = vmatmul.mubr.msk.f32.gmra.mxu1 %vm519_vm2, %v1416_v23  ;;  %v1304_v23 = vld [vmem:[%s2017_s5 + $0x18] sm:$0xff] }
 0x1e6   : > { %1625 = vmatpush3.msra.mxu1 %v764_v25  ;;  %v762_v26 = vpop.permute.xlu1 %761  ;;  %1632 = vmatprep.mubr.msk.f32.mxu1 %vm519_vm2, %v1431_v24 }
 0x1e7   : > { %1626 = vmatprep.subr.mxu1 %v762_v26 }
 0x1e8   : > { %v760_v27 = vpop.permute.xlu0 %759  ;;  %1627 = vmatpush3.msra.mxu1 %v762_v26 }
 0x1e9   : > { %1628 = vmatprep.subr.mxu1 %v760_v27 }
 0x1ea   : > { %1629 = vmatpush3.msra.mxu1 %v760_v27  ;;  %v758_v28 = vpop.permute.xlu1 %757 }
 0x1eb   : > { %1630 = vmatprep.subr.mxu1 %v758_v28 }
 0x1ec   : > { %1631 = vmatpush3.msra.mxu1 %v758_v28 }
 0x1ed   : > { %1633 = vmatmul.mubr.msk.f32.vlgmr.msra.gmra.mxu1 %vm519_vm2, %v1432_v29 }
 0x1ee   : > { %1635 = vmatprep.mubr.msk.f32.mxu1 %vm519_vm2, %v1433_v30  ;;  %v1445_v30 = vld [vmem:[%s2016_s4 + $0x28] sm:$0xff] }
 0x1f1   : > { %1636 = vmatmul.mubr.msk.f32.gmra.mxu1 %vm519_vm2, %v1434_v31 }
 0x1f2   : > { %1638 = vmatprep.mubr.msk.f32.mxu1 %vm519_vm2, %v1435_v32 }
 0x1f5   : > { %1639 = vmatmul.mubr.msk.f32.gmra.mxu1 %vm519_vm2, %v1436_v33  ;;  %v935_v48 = vpop.permute.xlu0 %934  ;;  %v1446_v33 = vld [vmem:[%s2016_s4 + $0x30] sm:$0xff] }
 0x1f6   : > { %1689 = vmatprep.mubr.msk.f32.mxu1 %vm982_vm3, %v1456_v19 }
 0x1f7   : > { %v930_v45 = vpop.permute.xlu1 %929 }
 0x1f9   : > { %v920_v60 = vpop.permute.xlu0 %919 }
 0x1fb   : > { %v925_v54 = vpop.permute.xlu1 %924 }
 0x1fd   : > { %v910_v12 = vpop.permute.xlu0 %909 }
 0x1ff   : > { %v915_v8 = vpop.permute.xlu1 %914 }
 0x22a   : > { %v1609_v36 = vpop.f32.mrf.mxu0 }
 0x22c   : > { %v721_v39 = vpop.f32.mrf.mxu0 }
 0x22e   : > { %v1612_v40 = vpop.f32.mrf.mxu0 }
 0x230   : > { %v731_v42 = vpop.f32.mrf.mxu0 }
 0x232   : > { %v1615_v46 = vpop.f32.mrf.mxu0 }
 0x234   : > { %v741_v50 = vpop.f32.mrf.mxu0 }
 0x29d   : > { %v1584_v34 = vpop.f32.mrf.mxu1 }
 0x29e   : > { %v727_v62 = vadd.f32 %v1609_v36, %v1584_v34 }
 0x29f   : > { %v606_v35 = vpop.f32.mrf.mxu1 }
 0x2a0   : > { %v722_v2 = vadd.f32 %v721_v39, %v606_v35  ;;  %v1447_v35 = vld [vmem:[%s2016_s4 + $0x38] sm:$0xff]  ;;  %v949_v39 = vld [vmem:[%s2016_s4] sm:$0xff] }
 0x2a1   : > { %v1587_v37 = vpop.f32.mrf.mxu1 }
 0x2a2   : > { %v737_v52 = vadd.f32 %v1612_v40, %v1587_v37  ;;  %v950_v40 = vld [vmem:[%s2016_s4 + $0x8] sm:$0xff] }
 0x2a3   : > { %v616_v38 = vpop.f32.mrf.mxu1 }
 0x2a4   : > { %v732_v56 = vadd.f32 %v731_v42, %v616_v38  ;;  %v951_v42 = vld [vmem:[%s2016_s4 + $0x10] sm:$0xff] }
 0x2a5   : > { %v1590_v41 = vpop.f32.mrf.mxu1 }
 0x2a6   : > { %v747_v53 = vadd.f32 %v1615_v46, %v1590_v41  ;;  %v1457_v41 = vld [vmem:[%s2016_s4 + $0x48] sm:$0xff] }
 0x2a7   : > { %v626_v43 = vpop.f32.mrf.mxu1 }
 0x2a8   : > { %v742_v57 = vadd.f32 %v741_v50, %v626_v43  ;;  %v1458_v43 = vld [vmem:[%s2016_s4 + $0x50] sm:$0xff] }
 0x2ad   : > { %v1634_v44 = vpop.f32.mrf.mxu1 }
 0x2ae   : > { %v896_v4 = vadd.f32 %v1634_v44, %v727_v62  ;;  %v952_v44 = vld [vmem:[%s2016_s4 + $0x18] sm:$0xff] }
 0x2af   : > { %v866_v47 = vpop.f32.mrf.mxu1 }
 0x2b0   : > { %v895_v9 = vadd.f32 %v866_v47, %v722_v2  ;;  %v938_v13 = vadd.f32 %v915_v8, %v896_v4 }
 0x2b1   : > { %v1637_v49 = vpop.f32.mrf.mxu1 }
 0x2b2   : > { %v898_v58 = vadd.f32 %v1637_v49, %v737_v52  ;;  %v937_v15 = vadd.f32 %v910_v12, %v895_v9  ;;  %v1920_v17 = vmax.f32 %v938_v13, 0.0 }
 0x2b3   : > { %v876_v51 = vpop.f32.mrf.mxu1 }
 0x2b4   : > { %v897_v63 = vadd.f32 %v876_v51, %v732_v56  ;;  %v940_v5 = vadd.f32 %v925_v54, %v898_v58  ;;  %v1924_v18 = vmax.f32 %v937_v15, 0.0 }
 0x2b5   : > { %v1640_v55 = vpop.f32.mrf.mxu1 }
 0x2b6   : > { %v900_v59 = vadd.f32 %v1640_v55, %v747_v53  ;;  %v939_v10 = vadd.f32 %v920_v60, %v897_v63  ;;  %v946_v14 = vmax.f32 %v940_v5, 0.0 }
 0x2b7   : > { %v886_v61 = vpop.f32.mrf.mxu1 }
 0x2b8   : > { %v942_v0 = vadd.f32 %v935_v48, %v900_v59  ;;  %v899_v1 = vadd.f32 %v886_v61, %v742_v57  ;;  %v1917_v16 = vmax.f32 %v939_v10, 0.0 }
 0x2ba   : > { %v948_v6 = vmax.f32 %v942_v0, 0.0  ;;  %v941_v7 = vadd.f32 %v930_v45, %v899_v1  ;;  %v1459_v45 = vld [vmem:[%s2016_s4 + $0x58] sm:$0xff] }
 0x2bc   : > { %v947_v11 = vmax.f32 %v941_v7, 0.0  ;;  %974 = vrot.lane.b32.xlu1 %v948_v6, %s1716_s7 }
 0x2be   : > { %972 = vrot.lane.b32.xlu0 %v947_v11, %s1716_s7 }
 0x2c0   : > { %970 = vrot.lane.b32.xlu1 %v946_v14, %s1716_s7 }
 0x2c2   : > { %968 = vrot.lane.b32.xlu0 %v1917_v16, %s1716_s7 }
 0x2c4   : > { %966 = vrot.lane.b32.xlu1 %v1920_v17, %s1716_s7 }
 0x2c6   : > { %964 = vrot.lane.b32.xlu0 %v1924_v18, %s1716_s7 }
 0x2c8   : > { %1192 = vrot.lane.b32.xlu1 %v948_v6, %s1717_s16 }
 0x2ca   : > { %1190 = vrot.lane.b32.xlu0 %v947_v11, %s1717_s16 }
 0x2cc   : > { %1188 = vrot.lane.b32.xlu1 %v946_v14, %s1717_s16 }
 0x2ce   : > { %1186 = vrot.lane.b32.xlu0 %v1917_v16, %s1717_s16 }
 0x2d0   : > { %1184 = vrot.lane.b32.xlu1 %v1920_v17, %s1717_s16 }
 0x2d2   : > { %1182 = vrot.lane.b32.xlu0 %v1924_v18, %s1717_s16 }
 0x2d4   : > { %1307 = vperm.xlu1 %1707, %v1301_v20  }
 0x2d6   : > { %1312 = vperm.xlu0 %1706, %v1302_v21  }
 0x2d8   : > { %1317 = vperm.xlu1 %1707, %v1303_v22  }
 0x2da   : > { %1322 = vperm.xlu0 %1706, %v1304_v23  }
 0x32e   : > { %v975_v24 = vpop.permute.xlu1 %974 }
 0x32f   : > { %1641 = vmatprep.subr.mxu0 %v975_v24 }
 0x330   : > { %1642 = vmatpush3.msra.mxu0 %v975_v24  ;;  %v973_v25 = vpop.permute.xlu0 %972 }
 0x331   : > { %1643 = vmatprep.subr.mxu0 %v973_v25 }
 0x332   : > { %v971_v26 = vpop.permute.xlu1 %970  ;;  %1644 = vmatpush3.msra.mxu0 %v973_v25 }
 0x333   : > { %1645 = vmatprep.subr.mxu0 %v971_v26 }
 0x334   : > { %1646 = vmatpush3.msra.mxu0 %v971_v26  ;;  %v969_v27 = vpop.permute.xlu0 %968 }
 0x335   : > { %1647 = vmatprep.subr.mxu0 %v969_v27 }
 0x336   : > { %v967_v28 = vpop.permute.xlu1 %966  ;;  %1648 = vmatpush3.msra.mxu0 %v969_v27 }
 0x337   : > { %1649 = vmatprep.subr.mxu0 %v967_v28 }
 0x338   : > { %1650 = vmatpush3.msra.mxu0 %v967_v28  ;;  %v965_v29 = vpop.permute.xlu0 %964 }
 0x339   : > { %1651 = vmatprep.subr.mxu0 %v965_v29 }
 0x33a   : > { %v1193_v31 = vpop.permute.xlu1 %1192  ;;  %1652 = vmatpush3.msra.mxu0 %v965_v29 }
 0x33b   : > { %1654 = vmatmul.mubr.msk.f32.vlgmr.msra.gmra.mxu0 %vm982_vm3, %v1445_v30  ;;  %1659 = vmatprep.subr.mxu0 %v948_v6 }
 0x33c   : > { %1677 = vmatprep.subr.mxu1 %v1193_v31  ;;  %1660 = vmatpush3.msra.mxu0 %v948_v6  ;;  %v1191_v32 = vpop.permute.xlu0 %1190 }
 0x33d   : > { %1678 = vmatpush3.msra.mxu1 %v1193_v31  ;;  %1661 = vmatprep.subr.mxu0 %v947_v11 }
 0x33e   : > { %1679 = vmatprep.subr.mxu1 %v1191_v32  ;;  %v1189_v34 = vpop.permute.xlu1 %1188  ;;  %1662 = vmatpush3.msra.mxu0 %v947_v11 }
 0x33f   : > { %1680 = vmatpush3.msra.mxu1 %v1191_v32  ;;  %1663 = vmatprep.subr.mxu0 %v946_v14 }
 0x340   : > { %1681 = vmatprep.subr.mxu1 %v1189_v34  ;;  %1656 = vmatprep.mubr.msk.f32.mxu0 %vm982_vm3, %v1446_v33  ;;  %v1187_v36 = vpop.permute.xlu0 %1186 }
 0x341   : > { %1664 = vmatpush3.msra.mxu0 %v946_v14  ;;  %1682 = vmatpush3.msra.mxu1 %v1189_v34 }
 0x342   : > { %1657 = vmatmul.mubr.msk.f32.gmra.mxu0 %vm982_vm3, %v1447_v35  ;;  %1665 = vmatprep.subr.mxu0 %v1917_v16  ;;  %v1185_v37 = vpop.permute.xlu1 %1184 }
 0x343   : > { %1683 = vmatprep.subr.mxu1 %v1187_v36  ;;  %1666 = vmatpush3.msra.mxu0 %v1917_v16 }
 0x344   : > { %1684 = vmatpush3.msra.mxu1 %v1187_v36  ;;  %1667 = vmatprep.subr.mxu0 %v1920_v17  ;;  %v1183_v38 = vpop.permute.xlu0 %1182 }
 0x345   : > { %1685 = vmatprep.subr.mxu1 %v1185_v37  ;;  %1668 = vmatpush3.msra.mxu0 %v1920_v17 }
 0x346   : > { %1686 = vmatpush3.msra.mxu1 %v1185_v37  ;;  %1669 = vmatprep.subr.mxu0 %v1924_v18 }
 0x347   : > { %1687 = vmatprep.subr.mxu1 %v1183_v38  ;;  %1670 = vmatpush3.msra.mxu0 %v1924_v18 }
 0x348   : > { %1671 = vmatprep.mubr.msk.f32.mxu0 %vm982_vm3, %v949_v39  ;;  %1688 = vmatpush3.msra.mxu1 %v1183_v38 }
 0x349   : > { %1672 = vmatmul.mubr.msk.f32.vlgmr.msra.gmra.mxu0 %vm982_vm3, %v950_v40  ;;  %1690 = vmatmul.mubr.msk.f32.vlgmr.msra.gmra.mxu1 %vm982_vm3, %v1457_v41 }
 0x34a   : > { %1674 = vmatprep.mubr.msk.f32.mxu0 %vm982_vm3, %v951_v42  ;;  %1692 = vmatprep.mubr.msk.f32.mxu1 %vm982_vm3, %v1458_v43 }
 0x34d   : > { %1675 = vmatmul.mubr.msk.f32.gmra.mxu0 %vm982_vm3, %v952_v44  ;;  %1693 = vmatmul.mubr.msk.f32.gmra.mxu1 %vm982_vm3, %v1459_v45 }
 0x34f   : > { %v1308_v56 = vpop.permute.xlu1 %1307 }
 0x351   : > { %v1313_v52 = vpop.permute.xlu0 %1312 }
 0x353   : > { %v1318_v10 = vpop.permute.xlu1 %1317 }
 0x355   : > { %v1323_v5 = vpop.permute.xlu0 %1322 }
 0x3fb   : > { %v1655_v46 = vpop.f32.mrf.mxu0 }
 0x3fd   : > { %v1061_v47 = vpop.f32.mrf.mxu0 }
 0x402   : > { %v1658_v48 = vpop.f32.mrf.mxu0 }
 0x404   : > { %v1071_v49 = vpop.f32.mrf.mxu0 }
 0x409   : > { %v1673_v50 = vpop.f32.mrf.mxu0  ;;  %v1691_v51 = vpop.f32.mrf.mxu1 }
 0x40a   : > { %v1164_v53 = vadd.f32 %v1673_v50, %v1655_v46 }
 0x40b   : > { %v1158_v54 = vpop.f32.mrf.mxu0  ;;  %v1278_v55 = vpop.f32.mrf.mxu1 }
 0x40c   : > { %v1298_v57 = vadd.f32 %v1691_v51, %v1164_v53  ;;  %v1159_v58 = vadd.f32 %v1158_v54, %v1061_v47 }
 0x40d   : > { %v1676_v59 = vpop.f32.mrf.mxu0  ;;  %v1694_v60 = vpop.f32.mrf.mxu1 }
 0x40e   : > { %v1326_v61 = vadd.f32 %v1313_v52, %v1298_v57  ;;  %v1297_v62 = vadd.f32 %v1278_v55, %v1159_v58  ;;  %v1174_v63 = vadd.f32 %v1676_v59, %v1658_v48 }
 0x40f   : > { %v1168_v0 = vpop.f32.mrf.mxu0  ;;  %v1288_v6 = vpop.f32.mrf.mxu1 }
 0x410   : > { %v1330_v1 = vmax.f32 %v1326_v61, 0.0  ;;  %v1325_v2 = vadd.f32 %v1308_v56, %v1297_v62  ;;  %v1300_v3 = vadd.f32 %v1694_v60, %v1174_v63  ;;  %v1169_v4 = vadd.f32 %v1168_v0, %v1071_v49 }
 0x412   : > { %1335 = vst.msk [vmem:[%s251_s30 + $0x8] sm:$0xff] %vm1333_vm4, %v1330_v1  ;;  %v1329_v7 = vmax.f32 %v1325_v2, 0.0  ;;  %v1328_v8 = vadd.f32 %v1323_v5, %v1300_v3  ;;  %v1299_v9 = vadd.f32 %v1288_v6, %v1169_v4 }
 0x414   : > { %1334 = vst.msk [vmem:[%s251_s30] sm:$0xff] %vm1333_vm4, %v1329_v7  ;;  %v1332_v11 = vmax.f32 %v1328_v8, 0.0  ;;  %v1327_v12 = vadd.f32 %v1318_v10, %v1299_v9 }
 0x416   : > { %1337 = vst.msk [vmem:[%s251_s30 + $0x18] sm:$0xff] %vm1333_vm4, %v1332_v11  ;;  %v1331_v13 = vmax.f32 %v1327_v12, 0.0 }
 0x418   : > { %1336 = vst.msk [vmem:[%s251_s30 + $0x10] sm:$0xff] %vm1333_vm4, %v1331_v13 }
 0x419 PF: > { %s16_s21 = sadd.s32 1, %s1714_s21  }
 0x41a   : > { %p13_p4 = scmp.ge.s32.totalorder %s16_s21, 4  }
 0x41c   :  { %15 = sbr.rel (!%p13_p4) target bundleno = 1 (0x1), region = 78 }

</bundles_post_ra>
